<compile_context>
chip_gen: v5e
topology: v5e:2x2
jax: 0.10.0
libtpu: 0.0.40
codegen_flags: <defaults>
</compile_context>

<pallas_src>
import jax
import jax.numpy as jnp
from jax import lax
from jax.experimental import pallas as pl
from jax.experimental.pallas import tpu as pltpu

LANE = 128  # batch lives on the 128-lane axis


def _make_kernel(D, S, H, lane, n_steps=None, dt=None):
    """Build the AttentiveODE kernel.

    n_steps is None  -> single RHS evaluation (module.forward semantics).
    n_steps = K      -> K fused explicit-Euler steps in one pallas_call.

    Ref layout (per batch-lane tile):
      sc_ref : (2*D,) SMEM   [w_attn_gru_half..., b2...]
      y_ref  : (D, lane)     g_ref : (D, S, lane)
      w_ref  : (H, 3*D+1)    packed [W1a^T | W1b^T | b1 | W2]
      out    : (D, lane)
    """

    def kernel(sc_ref, y_ref, g_ref, w_ref, out_ref):
        # ---- loop-invariant weight views (read/broadcast once, hoisted) --------
        w = w_ref[...]                                        # (H, 3D+1)
        w1a_cols = [w[:, d:d + 1] for d in range(D)]          # (H, 1) each
        w1b_cols = [w[:, D + d:D + d + 1] for d in range(D)]  # (H, 1) each
        b1_full = jnp.broadcast_to(w[:, 2 * D:2 * D + 1], (H, lane))
        w2_cols = [w[:, 2 * D + 1 + d:2 * D + 2 + d] for d in range(D)]
        wag = [sc_ref[d] for d in range(D)]                   # attn weight (gru half)
        b2 = [sc_ref[D + d] for d in range(D)]

        g = g_ref[...]                                        # (D, S, lane)
        g_rows = [g[d] for d in range(D)]                     # (S, lane) each

        def rhs(y):
            """dy/dt for one batch-lane tile; y: (D, lane)."""
            y_rows = [y[d:d + 1, :] for d in range(D)]        # (1, lane) each

            # Attention logits over the sequence (sublane) axis. The attn bias and
            # the y-half contribution are constant along S and cancel in the
            # softmax; the D=2 contraction is unrolled scalar FMAs (no XLU reduce).
            logits = wag[0] * g_rows[0]
            for d in range(1, D):
                logits = logits + wag[d] * g_rows[d]          # (S, lane)
            m = jnp.max(logits, axis=0, keepdims=True)        # (1, lane)
            e = jnp.exp(logits - m)                           # (S, lane)
            inv = pl.reciprocal(jnp.sum(e, axis=0, keepdims=True), approx=True)

            # Context rows: softmax normalization folded into the reduction;
            # `score` is never materialized.
            ctx_rows = [jnp.sum(e * g_rows[d], axis=0, keepdims=True) * inv
                        for d in range(D)]                    # (1, lane) each

            # Layer 1: K = 2*D contraction as VPU outer-product FMAs
            # (an MXU matmul at K=2 would waste >99% of the array).
            pre = b1_full
            for d in range(D):
                pre = pre + w1a_cols[d] * y_rows[d] + w1b_cols[d] * ctx_rows[d]
            h = jnp.tanh(pre)                                 # (H, lane)

            # Layer 2: per-output-channel sublane reductions over H.
            out_rows = [jnp.sum(h * w2_cols[d], axis=0, keepdims=True) + b2[d]
                        for d in range(D)]
            return jnp.concatenate(out_rows, axis=0)          # (D, lane)

        y0 = y_ref[...]
        if n_steps is None:
            out_ref[...] = rhs(y0).astype(out_ref.dtype)
        else:
            def body(_, y):
                return y + dt * rhs(y)
            yk = lax.fori_loop(0, n_steps, body, y0, unroll=True)
            out_ref[...] = yk.astype(out_ref.dtype)

    return kernel


def _pack_operands(y, gru_hidden, params):
    """Wrapper-side layout plumbing (outside the hot kernel)."""
    w_attn, b_attn, w1, b1, w2, b2 = params
    del b_attn  # constant along the softmax axis -> cancels exactly, never shipped
    B, S, D = gru_hidden.shape
    H = w1.shape[1]

    # Lane-dense layout: batch on the 128-lane axis (zero-padded).
    b_pad = max(LANE, ((B + LANE - 1) // LANE) * LANE)
    y_t = jnp.zeros((D, b_pad), jnp.float32).at[:, :B].set(
        y.reshape(B, D).T.astype(jnp.float32))
    g_t = jnp.zeros((D, S, b_pad), jnp.float32).at[:, :, :B].set(
        jnp.transpose(gru_hidden, (2, 1, 0)).astype(jnp.float32))

    # One packed VMEM slab (single DMA descriptor):
    #   cols [0:D) = W1a^T, [D:2D) = W1b^T, [2D] = b1, [2D+1:3D+1) = W2
    slab = jnp.concatenate(
        [w1[:D, :].T, w1[D:, :].T, b1.reshape(H, 1), w2], axis=1
    ).astype(jnp.float32)                                     # (H, 3D+1)

    # SMEM scalars: gru-half of attn weight + layer-2 bias.
    scalars = jnp.concatenate(
        [w_attn[:D, 0].reshape(D), b2.reshape(D)]).astype(jnp.float32)  # (2D,)

    return scalars, y_t, g_t, slab, (B, S, D, H, b_pad)


def _call(kernel, scalars, y_t, g_t, slab, dims):
    B, S, D, H, b_pad = dims
    n_tiles = b_pad // LANE
    wcols = slab.shape[1]
    return pl.pallas_call(
        kernel,
        out_shape=jax.ShapeDtypeStruct((D, b_pad), jnp.float32),
        grid=(n_tiles,),
        in_specs=[
            pl.BlockSpec(memory_space=pltpu.MemorySpace.SMEM),   # scalars
            pl.BlockSpec((D, LANE), lambda i: (0, i)),           # y tile
            pl.BlockSpec((D, S, LANE), lambda i: (0, 0, i)),     # gru tile
            pl.BlockSpec((H, wcols), lambda i: (0, 0)),          # weight slab
        ],
        out_specs=pl.BlockSpec((D, LANE), lambda i: (0, i)),
        compiler_params=pltpu.CompilerParams(
            dimension_semantics=("parallel",)),                  # v7x: 2nd TC
    )(scalars, y_t, g_t, slab)


def attentive_ode_forward(t, y, gru_hidden, params):
    """Single RHS evaluation (module.forward). y: (B,1,D), gru: (B,S,D) -> (B,1,D)."""
    del t  # unused by the reference forward (ODE-solver API parity)
    scalars, y_t, g_t, slab, dims = _pack_operands(y, gru_hidden, params)
    B, S, D, H, b_pad = dims
    kernel = _make_kernel(D, S, H, LANE)
    out = _call(kernel, scalars, y_t, g_t, slab, dims)
    return out[:, :B].T.reshape(B, 1, D)


def attentive_ode_fused_euler(t, y, gru_hidden, params, *, n_steps, dt):
    """K explicit-Euler steps of dy/dt = AttentiveODE(t, y) fused into ONE
    pallas_call: weights DMA'd once, y carried in vregs -> per-call launch/DMA
    cost amortized across all solver evaluations."""
    del t
    scalars, y_t, g_t, slab, dims = _pack_operands(y, gru_hidden, params)
    B, S, D, H, b_pad = dims
    kernel = _make_kernel(D, S, H, LANE, n_steps=int(n_steps), dt=float(dt))
    out = _call(kernel, scalars, y_t, g_t, slab, dims)
    return out[:, :B].T.reshape(B, 1, D)


def init_params(key, dim_y=2, dim_hidden=32):
    """Synthetic init: net linears ~ N(0, 0.1) with zero bias (as in the module);
    attn gets arbitrary nonzero values (its bias cancels in the softmax anyway)."""
    k0, k1, k2, k3 = jax.random.split(key, 4)
    w_attn = 0.1 * jax.random.normal(k0, (2 * dim_y, 1), dtype=jnp.float32)
    b_attn = 0.1 * jax.random.normal(k1, (1, 1), dtype=jnp.float32)
    w1 = 0.1 * jax.random.normal(k2, (2 * dim_y, dim_hidden), dtype=jnp.float32)
    b1 = jnp.zeros((1, dim_hidden), dtype=jnp.float32)
    w2 = 0.1 * jax.random.normal(k3, (dim_hidden, dim_y), dtype=jnp.float32)
    b2 = jnp.zeros((1, dim_y), dtype=jnp.float32)
    return (w_attn, b_attn, w1, b1, w2, b2)


def attentive_ode_ref(t, y, gru_hidden, params):
    """Pure-JAX reference mirroring the PyTorch forward exactly (with concats + bias)."""
    del t
    w_attn, b_attn, w1, b1, w2, b2 = params
    B, S, D = gru_hidden.shape
    y_rep = jnp.broadcast_to(y, (B, S, D))
    attn_input = jnp.concatenate([gru_hidden, y_rep], axis=2)        # (B, S, 2D)
    attn_linear = attn_input @ w_attn + b_attn                        # (B, S, 1)
    attn_score = jax.nn.softmax(attn_linear, axis=1)                  # (B, S, 1)
    ctx = jnp.einsum('bsk,bsd->bkd', attn_score, gru_hidden)          # (B, 1, D)
    ode_input = jnp.concatenate([y, ctx], axis=2)                     # (B, 1, 2D)
    h = jnp.tanh(ode_input @ w1 + b1)                                 # (B, 1, H)
    return h @ w2 + b2                                                # (B, 1, D)


if __name__ == "__main__":
    key = jax.random.PRNGKey(0)
    kp, ky, kg = jax.random.split(key, 3)

    dim_y, dim_hidden, batch, seq = 2, 32, 2, 8
    params = init_params(kp, dim_y=dim_y, dim_hidden=dim_hidden)
    y = jax.random.normal(ky, (batch, 1, dim_y), dtype=jnp.float32)
    gru_hidden = jax.random.normal(kg, (batch, seq, dim_y), dtype=jnp.float32)
    t = jnp.float32(0.0)

    # --- single RHS evaluation (module.forward semantics) -----------------------
    out = jax.block_until_ready(attentive_ode_forward(t, y, gru_hidden, params))
    ref = attentive_ode_ref(t, y, gru_hidden, params)
    assert out.shape == (batch, 1, dim_y)
    # tolerance relaxed vs 1e-5: pl.reciprocal(approx=True) in the softmax denom
    assert jnp.allclose(out, ref, atol=2e-3, rtol=2e-3), (out, ref)

    # --- K solver steps fused into one pallas_call (launch/DMA amortized) -------
    n_steps, dt = 8, 0.05
    out_fused = jax.block_until_ready(
        attentive_ode_fused_euler(t, y, gru_hidden, params, n_steps=n_steps, dt=dt))
    y_ref = y
    for _ in range(n_steps):
        y_ref = y_ref + dt * attentive_ode_ref(t, y_ref, gru_hidden, params)
    assert out_fused.shape == (batch, 1, dim_y)
    assert jnp.allclose(out_fused, y_ref, atol=5e-3, rtol=5e-3), (out_fused, y_ref)

    print("KERNEL_OK")
</pallas_src>

<mosaic_0001>
module attributes {stable_mosaic.version = 11 : i64} {
  func.func @kernel(%arg0: i32, %arg1: memref<4xf32, #tpu.memory_space<smem>>, %arg2: memref<2x128xf32, #tpu.memory_space<vmem>>, %arg3: memref<2x8x128xf32, #tpu.memory_space<vmem>>, %arg4: memref<32x7xf32, #tpu.memory_space<vmem>>, %arg5: memref<2x128xf32, #tpu.memory_space<vmem>>) attributes {dimension_semantics = [#tpu.dimension_semantics<parallel>], iteration_bounds = array<i64: 1>, scalar_prefetch = 0 : i64, scratch_operands = 0 : i64, tpu.core_type = #tpu.core_type<tc>, window_params = [{transform_indices = @transform_0, window_bounds = array<i64: 4>}, {transform_indices = @transform_1, window_bounds = array<i64: 2, 128>}, {transform_indices = @transform_2, window_bounds = array<i64: 2, 8, 128>}, {pipeline_mode = #tpu.pipeline_mode<synchronous>, transform_indices = @transform_3, window_bounds = array<i64: 32, 7>}, {transform_indices = @transform_4, window_bounds = array<i64: 2, 128>}]} {
    %c0 = arith.constant 0 : index
    %c0_0 = arith.constant 0 : index
    %0 = vector.load %arg4[%c0, %c0_0] : memref<32x7xf32, #tpu.memory_space<vmem>>, vector<32x7xf32>
    %1 = vector.extract_strided_slice %0 {offsets = [0, 0], sizes = [32, 1], strides = [1, 1]} : vector<32x7xf32> to vector<32x1xf32>
    %2 = vector.extract_strided_slice %0 {offsets = [0, 1], sizes = [32, 1], strides = [1, 1]} : vector<32x7xf32> to vector<32x1xf32>
    %3 = vector.extract_strided_slice %0 {offsets = [0, 2], sizes = [32, 1], strides = [1, 1]} : vector<32x7xf32> to vector<32x1xf32>
    %4 = vector.extract_strided_slice %0 {offsets = [0, 3], sizes = [32, 1], strides = [1, 1]} : vector<32x7xf32> to vector<32x1xf32>
    %5 = vector.extract_strided_slice %0 {offsets = [0, 4], sizes = [32, 1], strides = [1, 1]} : vector<32x7xf32> to vector<32x1xf32>
    %6 = vector.shape_cast %5 : vector<32x1xf32> to vector<32x1xf32>
    %7 = vector.broadcast %6 : vector<32x1xf32> to vector<32x128xf32>
    %8 = vector.extract_strided_slice %0 {offsets = [0, 5], sizes = [32, 1], strides = [1, 1]} : vector<32x7xf32> to vector<32x1xf32>
    %9 = vector.extract_strided_slice %0 {offsets = [0, 6], sizes = [32, 1], strides = [1, 1]} : vector<32x7xf32> to vector<32x1xf32>
    %c0_1 = arith.constant 0 : index
    %10 = memref.load %arg1[%c0_1] : memref<4xf32, #tpu.memory_space<smem>>
    %c1 = arith.constant 1 : index
    %11 = memref.load %arg1[%c1] : memref<4xf32, #tpu.memory_space<smem>>
    %c2 = arith.constant 2 : index
    %12 = memref.load %arg1[%c2] : memref<4xf32, #tpu.memory_space<smem>>
    %c3 = arith.constant 3 : index
    %13 = memref.load %arg1[%c3] : memref<4xf32, #tpu.memory_space<smem>>
    %c0_2 = arith.constant 0 : index
    %c0_3 = arith.constant 0 : index
    %c0_4 = arith.constant 0 : index
    %14 = vector.load %arg3[%c0_2, %c0_3, %c0_4] : memref<2x8x128xf32, #tpu.memory_space<vmem>>, vector<2x8x128xf32>
    %15 = vector.extract_strided_slice %14 {offsets = [0, 0, 0], sizes = [1, 8, 128], strides = [1, 1, 1]} : vector<2x8x128xf32> to vector<1x8x128xf32>
    %16 = vector.shape_cast %15 : vector<1x8x128xf32> to vector<8x128xf32>
    %17 = vector.extract_strided_slice %14 {offsets = [1, 0, 0], sizes = [1, 8, 128], strides = [1, 1, 1]} : vector<2x8x128xf32> to vector<1x8x128xf32>
    %18 = vector.shape_cast %17 : vector<1x8x128xf32> to vector<8x128xf32>
    %c0_5 = arith.constant 0 : index
    %c0_6 = arith.constant 0 : index
    %19 = vector.load %arg2[%c0_5, %c0_6] : memref<2x128xf32, #tpu.memory_space<vmem>>, vector<2x128xf32>
    %20 = vector.extract_strided_slice %19 {offsets = [0, 0], sizes = [1, 128], strides = [1, 1]} : vector<2x128xf32> to vector<1x128xf32>
    %21 = vector.extract_strided_slice %19 {offsets = [1, 0], sizes = [1, 128], strides = [1, 1]} : vector<2x128xf32> to vector<1x128xf32>
    %22 = vector.broadcast %10 : f32 to vector<8x128xf32>
    %23 = arith.mulf %22, %16 : vector<8x128xf32>
    %24 = vector.broadcast %11 : f32 to vector<8x128xf32>
    %25 = arith.mulf %24, %18 : vector<8x128xf32>
    %26 = arith.addf %23, %25 : vector<8x128xf32>
    %cst = arith.constant dense<0xFF800000> : vector<128xf32>
    %27 = vector.multi_reduction <maximumf>, %26, %cst [0] : vector<8x128xf32> to vector<128xf32>
    %28 = vector.shape_cast %27 : vector<128xf32> to vector<1x128xf32>
    %29 = vector.broadcast %28 : vector<1x128xf32> to vector<8x128xf32>
    %30 = arith.subf %26, %29 : vector<8x128xf32>
    %31 = math.exp %30 : vector<8x128xf32>
    %cst_7 = arith.constant dense<0.000000e+00> : vector<128xf32>
    %32 = vector.multi_reduction <add>, %31, %cst_7 [0] : vector<8x128xf32> to vector<128xf32>
    %33 = vector.shape_cast %32 : vector<128xf32> to vector<1x128xf32>
    %34 = tpu.reciprocal %33 {approx = true} : vector<1x128xf32> -> vector<1x128xf32>
    %35 = arith.mulf %31, %16 : vector<8x128xf32>
    %cst_8 = arith.constant dense<0.000000e+00> : vector<128xf32>
    %36 = vector.multi_reduction <add>, %35, %cst_8 [0] : vector<8x128xf32> to vector<128xf32>
    %37 = vector.shape_cast %36 : vector<128xf32> to vector<1x128xf32>
    %38 = arith.mulf %37, %34 : vector<1x128xf32>
    %39 = arith.mulf %31, %18 : vector<8x128xf32>
    %cst_9 = arith.constant dense<0.000000e+00> : vector<128xf32>
    %40 = vector.multi_reduction <add>, %39, %cst_9 [0] : vector<8x128xf32> to vector<128xf32>
    %41 = vector.shape_cast %40 : vector<128xf32> to vector<1x128xf32>
    %42 = arith.mulf %41, %34 : vector<1x128xf32>
    %43 = vector.broadcast %1 : vector<32x1xf32> to vector<32x128xf32>
    %44 = vector.broadcast %20 : vector<1x128xf32> to vector<32x128xf32>
    %45 = arith.mulf %43, %44 : vector<32x128xf32>
    %46 = arith.addf %7, %45 : vector<32x128xf32>
    %47 = vector.broadcast %3 : vector<32x1xf32> to vector<32x128xf32>
    %48 = vector.broadcast %38 : vector<1x128xf32> to vector<32x128xf32>
    %49 = arith.mulf %47, %48 : vector<32x128xf32>
    %50 = arith.addf %46, %49 : vector<32x128xf32>
    %51 = vector.broadcast %2 : vector<32x1xf32> to vector<32x128xf32>
    %52 = vector.broadcast %21 : vector<1x128xf32> to vector<32x128xf32>
    %53 = arith.mulf %51, %52 : vector<32x128xf32>
    %54 = arith.addf %50, %53 : vector<32x128xf32>
    %55 = vector.broadcast %4 : vector<32x1xf32> to vector<32x128xf32>
    %56 = vector.broadcast %42 : vector<1x128xf32> to vector<32x128xf32>
    %57 = arith.mulf %55, %56 : vector<32x128xf32>
    %58 = arith.addf %54, %57 : vector<32x128xf32>
    %59 = math.tanh %58 : vector<32x128xf32>
    %60 = vector.broadcast %8 : vector<32x1xf32> to vector<32x128xf32>
    %61 = arith.mulf %59, %60 : vector<32x128xf32>
    %cst_10 = arith.constant dense<0.000000e+00> : vector<128xf32>
    %62 = vector.multi_reduction <add>, %61, %cst_10 [0] : vector<32x128xf32> to vector<128xf32>
    %63 = vector.shape_cast %62 : vector<128xf32> to vector<1x128xf32>
    %64 = vector.broadcast %12 : f32 to vector<1x128xf32>
    %65 = arith.addf %63, %64 : vector<1x128xf32>
    %66 = vector.broadcast %9 : vector<32x1xf32> to vector<32x128xf32>
    %67 = arith.mulf %59, %66 : vector<32x128xf32>
    %cst_11 = arith.constant dense<0.000000e+00> : vector<128xf32>
    %68 = vector.multi_reduction <add>, %67, %cst_11 [0] : vector<32x128xf32> to vector<128xf32>
    %69 = vector.shape_cast %68 : vector<128xf32> to vector<1x128xf32>
    %70 = vector.broadcast %13 : f32 to vector<1x128xf32>
    %71 = arith.addf %69, %70 : vector<1x128xf32>
    %72 = tpu.concatenate %65, %71 in 0 : vector<1x128xf32>, vector<1x128xf32> -> vector<2x128xf32>
    %c0_12 = arith.constant 0 : index
    %c0_13 = arith.constant 0 : index
    %73 = vector.load %arg5[%c0_12, %c0_13] : memref<2x128xf32, #tpu.memory_space<vmem>>, vector<2x128xf32>
    tpu.vector_store %arg5[%c0_12, %c0_13], %72 {strides = array<i32>} : memref<2x128xf32, #tpu.memory_space<vmem>>, vector<2x128xf32>,
    return
  }
  func.func @transform_0(%arg0: i32) -> i32 {
    %c0_i32 = arith.constant 0 : i32
    %c0_i32_0 = arith.constant 0 : i32
    return %c0_i32 : i32
  }
  func.func @transform_1(%arg0: i32) -> (i32, i32) {
    %c0_i32 = arith.constant 0 : i32
    %c0_i32_0 = arith.constant 0 : i32
    return %c0_i32, %arg0 : i32, i32
  }
  func.func @transform_2(%arg0: i32) -> (i32, i32, i32) {
    %c0_i32 = arith.constant 0 : i32
    %c0_i32_0 = arith.constant 0 : i32
    %c0_i32_1 = arith.constant 0 : i32
    return %c0_i32, %c0_i32_0, %arg0 : i32, i32, i32
  }
  func.func @transform_3(%arg0: i32) -> (i32, i32) {
    %c0_i32 = arith.constant 0 : i32
    %c0_i32_0 = arith.constant 0 : i32
    %c0_i32_1 = arith.constant 0 : i32
    return %c0_i32, %c0_i32_0 : i32, i32
  }
  func.func @transform_4(%arg0: i32) -> (i32, i32) {
    %c0_i32 = arith.constant 0 : i32
    %c0_i32_0 = arith.constant 0 : i32
    return %c0_i32, %arg0 : i32, i32
  }
}

</mosaic_0001>

<bundles_post_ra>
// kernel: tpu_custom_call.1
= control target key start
LH: loop header
LB: loop body
LE: loop exit
PB: predicated region body
PF: predicated region fallthrough
CT: control target
= control target key end

     0   :  { %9 = vsyncpa [#allocation4], 0  ;;  %s428_s0 = inlined_call_operand.vmem [shape: f32[4], index: 0, kind: input, shape index: {}]   ;;  %s429_s1 = inlined_call_operand.vmem [shape: f32[2,128], index: 1, kind: input, shape index: {}]   ;;  %s430_s2 = inlined_call_operand.vmem [shape: f32[2,8,128], index: 2, kind: input, shape index: {}]   ;;  %s431_s3 = inlined_call_operand.vmem [shape: f32[32,7], index: 3, kind: input, shape index: {}]   ;;  %s432_s4 = inlined_call_operand.hbm [shape: f32[2,128], index: 4, kind: output, shape index: {}]  }
   0x1   :  { %10 = vsyncpa [#allocation3], 0  ;;  %s16_s17 = sshll.u32 %s428_s0, 4  ;;  %s367_s18 = smov [#allocation2]   ;;  %s17_s17 = int_to_ptr.vmem [resolvable:$true] %s16_s17 }
   0x2   :  { %19 = dma.vmem_to_smem %s17_s17, 16, %s367_s18, [#allocation4]  }
   0x3   :  { %363 = dma.done.wait [#allocation4], 16  }
   0x4   :  { %364 = vsyncadd [#allocation4], 4294967280 }
   0x5   :  { %30 = sfence }
   0x6   :  { %v33_v0 = vld [vmem:[%s431_s3 + $0x10] sm:$0xff]  ;;  %v31_v1 = vld [vmem:[%s431_s3] sm:$0xff]  ;;  %v368_v2 = vmov 4   ;;  %v369_v3 = vmov 0   ;;  %v34_v4 = vld [vmem:[%s431_s3 + $0x18] sm:$0xff]  ;;  %v370_v6 = vmov 2  }
   0x7   :  { %296 = vset.pattern.permute.xlu1 %v368_v2  ;;  %295 = vset.pattern.permute.xlu0 %v368_v2  ;;  %v32_v5 = vld [vmem:[%s431_s3 + $0x8] sm:$0xff]  ;;  %v371_v7 = vmov 1   ;;  %v372_v8 = vmov 3   ;;  %v373_v9 = vmov 5   ;;  %v374_v10 = vmov 6   ;;  %s55_s3 = sld [smem:[#allocation2]] }
   0x8   :  { %47 = vperm.xlu1 %296, %v33_v0   ;;  %37 = vperm.xlu0 %295, %v31_v1   ;;  %s283_s26 = sld [smem:[#allocation2 + $0x1]]  ;;  %v59_v11 = vld [vmem:[%s430_s2] sm:$0xff]  ;;  %v60_v12 = vld [vmem:[%s430_s2 + $0x8] sm:$0xff]  ;;  %s375_s7 = smov [#allocation5]   ;;  %vm263_vm0 = vcmask 1040384  }
   0x9   :  { %297 = vset.pattern.permute.xlu2 %v369_v3  ;;  %v61_v56 = vld [vmem:[%s429_s1] sm:$0x3]  ;;  %s284_s1 = sld [smem:[#allocation2 + $0x2]]  ;;  %s271_s8 = sshll.u32 %s375_s7, 4  ;;  %s272_s8 = int_to_ptr.vmem [resolvable:$true] %s271_s8 }
   0xa   :  { %100 = vperm.xlu2 %297, %v31_v1   ;;  %v115_v60 = vperm.slane %v61_v56, 0  ;;  %s285_s6 = sld [smem:[#allocation2 + $0x3]]  ;;  %s273_s11 = sshll.u32 %s432_s4, 4  ;;  %s274_s11 = int_to_ptr.hbm [resolvable:$true] %s273_s11 }
   0xd   :  { %v62_v13 = vstv %s55_s3 }
   0xe   :  { %v64_v14 = vstv %s283_s26  ;;  %v63_v15 = vmul.f32 %v62_v13, %v59_v11 }
   0xf   :  { %v65_v16 = vmul.f32 %v64_v14, %v60_v12 }
  0x10   :  { %52 = vperm.xlu1 %296, %v34_v4   ;;  %42 = vperm.xlu0 %295, %v32_v5  }
  0x11   :  { %v66_v17 = vadd.f32 %v65_v16, %v63_v15 }
  0x12   :  { %104 = vperm.xlu2 %297, %v32_v5  }
  0x13   :  { %v67_v18 = vrot.slane %v66_v17, 4 }
  0x15   :  { %v68_v19 = vmax.f32 %v66_v17, %v67_v18 }
  0x17   :  { %v69_v20 = vrot.slane %v68_v19, 2 }
  0x18   :  { %299 = vset.pattern.permute.xlu1 %v369_v3  ;;  %298 = vset.pattern.permute.xlu0 %v369_v3 }
  0x19   :  { %112 = vperm.xlu1 %299, %v34_v4   ;;  %108 = vperm.xlu0 %298, %v33_v0   ;;  %v70_v21 = vmax.f32 %v68_v19, %v69_v20 }
  0x1a   :  { %300 = vset.pattern.permute.xlu2 %v370_v6 }
  0x1b   :  { %125 = vperm.xlu2 %300, %v31_v1   ;;  %v71_v22 = vrot.slane %v70_v21, 1 }
  0x1d   :  { %v72_v24 = vmax.f32 %v70_v21, %v71_v22 }
  0x1f   :  { %v73_v26 = vsub.f32 %v66_v17, %v72_v24 }
  0x21   :  { %301 = vset.pattern.permute.xlu1 %v370_v6  ;;  %302 = vset.pattern.permute.xlu0 %v370_v6  ;;  %v74_v28 = vmul.f32 1.442695, %v73_v26 }
  0x22   :  { %129 = vperm.xlu1 %301, %v32_v5   ;;  %137 = vperm.xlu0 %302, %v34_v4  }
  0x23   :  { %133 = vperm.xlu2 %300, %v33_v0   ;;  %315 = vpow2.f32 %v74_v28 }
  0x29   :  { %v316_v31 = vpop.eup %315 }
  0x2a   :  { %303 = vset.pattern.permute.xlu1 %v371_v7  ;;  %305 = vset.pattern.permute.xlu0 %v372_v8  ;;  %v76_v32 = vrot.slane %v316_v31, 4  ;;  %v83_v36 = vmul.f32 %v316_v31, %v59_v11  ;;  %v91_v41 = vmul.f32 %v316_v31, %v60_v12 }
  0x2b   :  { %149 = vperm.xlu1 %303, %v31_v1   ;;  %304 = vset.pattern.permute.xlu2 %v371_v7 }
  0x2c   :  { %153 = vperm.xlu2 %304, %v32_v5   ;;  %174 = vperm.xlu0 %305, %v31_v1   ;;  %v77_v35 = vadd.f32 %v316_v31, %v76_v32  ;;  %v84_v39 = vrot.slane %v83_v36, 4  ;;  %v92_v45 = vrot.slane %v91_v41, 4 }
  0x2e   :  { %v78_v38 = vrot.slane %v77_v35, 2  ;;  %v85_v44 = vadd.f32 %v84_v39, %v83_v36  ;;  %v93_v49 = vadd.f32 %v92_v45, %v91_v41 }
  0x30   :  { %v79_v42 = vadd.f32 %v78_v38, %v77_v35  ;;  %v86_v48 = vrot.slane %v85_v44, 2  ;;  %v94_v54 = vrot.slane %v93_v49, 2 }
  0x32   :  { %v80_v46 = vrot.slane %v79_v42, 1  ;;  %v87_v52 = vadd.f32 %v86_v48, %v85_v44  ;;  %v95_v58 = vadd.f32 %v94_v54, %v93_v49 }
  0x33   :  { %157 = vperm.xlu1 %303, %v33_v0  }
  0x34   :  { %161 = vperm.xlu2 %304, %v34_v4   ;;  %309 = vset.pattern.permute.xlu0 %v373_v9  ;;  %v81_v51 = vadd.f32 %v80_v46, %v79_v42  ;;  %v88_v55 = vrot.slane %v87_v52, 1  ;;  %v96_v63 = vrot.slane %v95_v58, 1 }
  0x35   :  { %206 = vperm.xlu0 %309, %v32_v5  }
  0x36   :  { %317 = vrcp.f32 %v81_v51  ;;  %v89_v61 = vadd.f32 %v88_v55, %v87_v52 }
  0x3b   :  { %306 = vset.pattern.permute.xlu1 %v372_v8 }
  0x3c   :  { %178 = vperm.xlu1 %306, %v32_v5   ;;  %307 = vset.pattern.permute.xlu2 %v372_v8  ;;  %v318_v62 = vpop.eup %317 }
  0x3d   :  { %182 = vperm.xlu2 %307, %v33_v0   ;;  %214 = vperm.xlu0 %309, %v34_v4   ;;  %v90_v3 = vmul.f32 %v318_v62, %v89_v61 }
  0x44   :  { %186 = vperm.xlu1 %306, %v34_v4  }
  0x45   :  { %308 = vset.pattern.permute.xlu2 %v373_v9  ;;  %314 = vset.pattern.permute.xlu0 %v374_v10 }
  0x46   :  { %202 = vperm.xlu2 %308, %v31_v1  }
  0x4c   :  { %310 = vset.pattern.permute.xlu1 %v374_v10 }
  0x4d   :  { %233 = vperm.xlu1 %310, %v31_v1  }
  0x4e   :  { %311 = vset.pattern.permute.xlu2 %v374_v10 }
  0x4f   :  { %237 = vperm.xlu2 %311, %v32_v5   ;;  %v164_v5 = vperm.slane %v61_v56, 1 }
  0x55   :  { %312 = vset.pattern.permute.xlu1 %v373_v9 }
  0x56   :  { %210 = vperm.xlu1 %312, %v33_v0  }
  0x57   :  { %241 = vperm.xlu2 %311, %v33_v0  }
  0x5e   :  { %313 = vset.pattern.permute.xlu1 %v374_v10 }
  0x5f   :  { %245 = vperm.xlu1 %313, %v34_v4   ;;  %v97_v4 = vadd.f32 %v96_v63, %v95_v58 }
  0x61   :  { %v98_v13 = vmul.f32 %v318_v62, %v97_v4 }
  0x64   :  { %v101_v23 = vpop.permute.xlu2 %100 }
  0x65   :  { %v116_v1 = vmul.f32 %v115_v60, %v101_v23 }
  0x6c   :  { %v105_v27 = vpop.permute.xlu2 %104 }
  0x6d   :  { %v117_v2 = vmul.f32 %v115_v60, %v105_v27 }
  0x75   :  { %v126_v30 = vpop.permute.xlu2 %125 }
  0x76   :  { %v140_v10 = vmul.f32 %v126_v30, %v90_v3 }
  0x7a   :  { %v48_v25 = vpop.permute.xlu1 %47  ;;  %v38_v34 = vpop.permute.xlu0 %37 }
  0x7b   :  { %v120_v11 = vadd.f32 %v116_v1, %v38_v34 }
  0x7d   :  { %v134_v37 = vpop.permute.xlu2 %133  ;;  %v144_v21 = vadd.f32 %v140_v10, %v120_v11 }
  0x7e   :  { %v142_v18 = vmul.f32 %v134_v37, %v90_v3 }
  0x82   :  { %v53_v29 = vpop.permute.xlu1 %52  ;;  %v43_v43 = vpop.permute.xlu0 %42 }
  0x83   :  { %v121_v12 = vadd.f32 %v117_v2, %v43_v43 }
  0x86   :  { %v154_v47 = vpop.permute.xlu2 %153 }
  0x87   :  { %v166_v14 = vmul.f32 %v164_v5, %v154_v47 }
  0x8b   :  { %v113_v33 = vpop.permute.xlu1 %112  ;;  %v109_v53 = vpop.permute.xlu0 %108 }
  0x8c   :  { %v118_v8 = vmul.f32 %v115_v60, %v109_v53  ;;  %v119_v15 = vmul.f32 %v115_v60, %v113_v33 }
  0x8e   :  { %v162_v57 = vpop.permute.xlu2 %161  ;;  %v122_v19 = vadd.f32 %v118_v8, %v48_v25  ;;  %v123_v26 = vadd.f32 %v119_v15, %v53_v29  ;;  %v261_v15 = vstv %s285_s6 }
  0x8f   :  { %v168_v34 = vmul.f32 %v164_v5, %v162_v57 }
  0x90   :  { %v146_v30 = vadd.f32 %v142_v18, %v122_v19 }
  0x94   :  { %v130_v40 = vpop.permute.xlu1 %129  ;;  %v138_v0 = vpop.permute.xlu0 %137 }
  0x95   :  { %v141_v6 = vmul.f32 %v130_v40, %v90_v3  ;;  %v143_v22 = vmul.f32 %v138_v0, %v90_v3 }
  0x97   :  { %v183_v9 = vpop.permute.xlu2 %182  ;;  %v145_v16 = vadd.f32 %v141_v6, %v121_v12  ;;  %v147_v35 = vadd.f32 %v143_v22, %v123_v26 }
  0x98   :  { %v191_v38 = vmul.f32 %v183_v9, %v98_v13 }
  0x99   :  { %v170_v31 = vadd.f32 %v166_v14, %v145_v16  ;;  %v172_v25 = vadd.f32 %v168_v34, %v147_v35  ;;  %v230_v14 = vstv %s284_s1 }
  0x9d   :  { %v150_v50 = vpop.permute.xlu1 %149 }
  0x9e   :  { %v165_v17 = vmul.f32 %v164_v5, %v150_v50  ;;  %v175_v20 = vpop.permute.xlu0 %174 }
  0x9f   :  { %v189_v28 = vmul.f32 %v175_v20, %v98_v13 }
  0xa0   :  { %v169_v27 = vadd.f32 %v165_v17, %v144_v21  ;;  %v203_v33 = vpop.permute.xlu2 %202 }
  0xa2   :  { %v193_v40 = vadd.f32 %v189_v28, %v169_v27 }
  0xa5   :  { %v158_v59 = vpop.permute.xlu1 %157 }
  0xa6   :  { %v167_v24 = vmul.f32 %v164_v5, %v158_v59 }
  0xa7   :  { %v207_v43 = vpop.permute.xlu0 %206 }
  0xa8   :  { %v171_v39 = vadd.f32 %v167_v24, %v146_v30 }
  0xa9   :  { %v238_v45 = vpop.permute.xlu2 %237 }
  0xaa   :  { %v195_v41 = vadd.f32 %v191_v38, %v171_v39 }
  0xae   :  { %v179_v7 = vpop.permute.xlu1 %178 }
  0xaf   :  { %v190_v23 = vmul.f32 %v179_v7, %v98_v13  ;;  %v215_v51 = vpop.permute.xlu0 %214 }
  0xb1   :  { %v194_v36 = vadd.f32 %v190_v23, %v170_v31  ;;  %v242_v59 = vpop.permute.xlu2 %241 }
  0xb3   :  { %319 = vtanh.f32 %v194_v36 }
  0xb4   :  { %321 = vtanh.f32 %v193_v40 }
  0xb5   :  { %323 = vtanh.f32 %v195_v41 }
  0xb6   :  { %v187_v32 = vpop.permute.xlu1 %186 }
  0xb7   :  { %v192_v37 = vmul.f32 %v187_v32, %v98_v13 }
  0xb9   :  { %v196_v42 = vadd.f32 %v192_v37, %v172_v25  ;;  %v320_v44 = vpop.eup %319 }
  0xba   :  { %v322_v46 = vpop.eup %321  ;;  %v218_v47 = vmul.f32 %v320_v44, %v207_v43  ;;  %v249_v58 = vmul.f32 %v320_v44, %v238_v45 }
  0xbb   :  { %325 = vtanh.f32 %v196_v42  ;;  %v324_v48 = vpop.eup %323  ;;  %v217_v49 = vmul.f32 %v322_v46, %v203_v33 }
  0xbc   :  { %v250_v63 = vmul.f32 %v324_v48, %v242_v59 }
  0xbd   :  { %v221_v53 = vadd.f32 %v218_v47, %v217_v49 }
  0xbf   :  { %v234_v29 = vpop.permute.xlu1 %233 }
  0xc0   :  { %v248_v55 = vmul.f32 %v322_v46, %v234_v29 }
  0xc1   :  { %v326_v50 = vpop.eup %325 }
  0xc2   :  { %v220_v56 = vmul.f32 %v326_v50, %v215_v51  ;;  %v252_v61 = vadd.f32 %v249_v58, %v248_v55 }
  0xc4   :  { %v253_v3 = vadd.f32 %v252_v61, %v250_v63 }
  0xc8   :  { %v211_v52 = vpop.permute.xlu1 %210 }
  0xc9   :  { %v219_v54 = vmul.f32 %v324_v48, %v211_v52 }
  0xcb   :  { %v222_v57 = vadd.f32 %v221_v53, %v219_v54 }
  0xcd   :  { %v223_v60 = vadd.f32 %v222_v57, %v220_v56 }
  0xcf   :  { %v224_v62 = vrot.slane %v223_v60, 4 }
  0xd1   :  { %v225_v0 = vadd.f32 %v224_v62, %v223_v60  ;;  %v246_v1 = vpop.permute.xlu1 %245 }
  0xd2   :  { %v251_v2 = vmul.f32 %v326_v50, %v246_v1 }
  0xd3   :  { %v226_v4 = vrot.slane %v225_v0, 2 }
  0xd4   :  { %v254_v5 = vadd.f32 %v253_v3, %v251_v2 }
  0xd5   :  { %v227_v6 = vadd.f32 %v226_v4, %v225_v0 }
  0xd6   :  { %v255_v7 = vrot.slane %v254_v5, 4 }
  0xd7   :  { %v228_v10 = vrot.slane %v227_v6, 1 }
  0xd8   :  { %v256_v8 = vadd.f32 %v255_v7, %v254_v5 }
  0xd9   :  { %v229_v13 = vadd.f32 %v228_v10, %v227_v6 }
  0xda   :  { %v257_v9 = vrot.slane %v256_v8, 2 }
  0xdb   :  { %v231_v17 = vadd.f32 %v230_v14, %v229_v13 }
  0xdc   :  { %v258_v11 = vadd.f32 %v257_v9, %v256_v8 }
  0xde   :  { %v259_v12 = vrot.slane %v258_v11, 1 }
  0xe0   :  { %v260_v16 = vadd.f32 %v259_v12, %v258_v11 }
  0xe2   :  { %v262_v18 = vadd.f32 %v261_v15, %v260_v16 }
  0xe4   :  { %v264_v19 = vsel %vm263_vm0, %v231_v17, %v262_v18 }
  0xe5   :  { %265 = vst [vmem:[#allocation5] sm:$0x3] %v264_v19 }
  0xe6   :  { %276 = dma.vmem_to_hbm [thread:$0]  %s272_s8, 32, %s274_s11, [#allocation3]  }
  0xe7   :  { %365 = dma.done.wait [#allocation3], 32  }
  0xe8   :  { %366 = vsyncadd [#allocation3], 4294967264 }
  0xe9   :  { %281 = vsyncpa [#allocation3], 1 }
  0xea   :  { %282 = vsyncpa [#allocation4], 1 }

</bundles_post_ra>
